<compile_context>
chip_gen: v7x
topology: tpu7x:2x2x1
jax: 0.10.0
libtpu: 0.0.40
codegen_flags: <defaults>
</compile_context>

<pallas_src>
import functools

import jax
import jax.numpy as jnp
from jax.experimental import pallas as pl
from jax.experimental.pallas import tpu as pltpu


def _linear_kernel_acc(x_ref, w_ref, b_ref, o_ref, acc_ref):
    # x_ref: (tm, tk)  w_ref: (tn, tk)  b_ref: (1, tn)  o_ref: (tm, tn)
    k = pl.program_id(2)

    @pl.when(k == 0)
    def _():
        acc_ref[...] = jnp.zeros_like(acc_ref)

    # Contract on F (last dim of both operands) -> x @ W.T without transpose.
    acc_ref[...] += jax.lax.dot_general(
        x_ref[...], w_ref[...],
        dimension_numbers=(((1,), (1,)), ((), ())),
        preferred_element_type=jnp.float32,
    )

    @pl.when(k == pl.num_programs(2) - 1)
    def _():
        o_ref[...] = (acc_ref[...] + b_ref[...]).astype(o_ref.dtype)


def _linear_kernel_single(x_ref, w_ref, b_ref, o_ref):
    # Whole F dimension in one tile: no accumulator scratch, no K loop.
    o_ref[...] = (
        jax.lax.dot_general(
            x_ref[...], w_ref[...],
            dimension_numbers=(((1,), (1,)), ((), ())),
            preferred_element_type=jnp.float32,
        )
        + b_ref[...]
    ).astype(o_ref.dtype)


def _round_up(v, m):
    return ((v + m - 1) // m) * m


@functools.partial(jax.jit, static_argnames=("tm", "tn", "tk"))
def my_neural_net_forward(x, weight, bias, *, tm=512, tn=256, tk=1024):
    """Equivalent of MyNeuralNet.forward.

    x:      (B, C, H, W) float32
    weight: (O, F) float32   (PyTorch nn.Linear convention, F = C*H*W)
    bias:   (O,)   float32
    returns (B, O) float32
    """
    B = x.shape[0]
    F = x.shape[1] * x.shape[2] * x.shape[3]
    O = weight.shape[0]

    x_flat = x.reshape(B, F)                       # nn.Flatten (keeps batch dim)

    # Pad to TPU-friendly shapes: batch -> multiple of 8 sublanes,
    # O and F -> multiples of 128 lanes.
    Bp = _round_up(B, 8)
    Op = _round_up(O, 128)
    Fp = _round_up(F, 128)

    # Clamp tiles to the (padded) dims and re-pad so tiles divide evenly.
    tm = min(tm, Bp)
    tn = min(tn, Op)
    tk = min(tk, Fp)
    Bp = _round_up(Bp, tm)
    Op = _round_up(Op, tn)
    Fp = _round_up(Fp, tk)

    x_p = jnp.pad(x_flat, ((0, Bp - B), (0, Fp - F)))
    w_p = jnp.pad(weight, ((0, Op - O), (0, Fp - F)))   # stays (O, F) layout
    b_p = jnp.pad(bias, (0, Op - O)).reshape(1, Op)

    grid_m = Bp // tm
    grid_n = Op // tn
    grid_k = Fp // tk

    # Per-step VMEM footprint (double-buffered inputs/output + accumulator)
    # plus headroom; capped well below v7x's 64 MiB physical VMEM.
    vmem_bytes = (2 * 4 * (tm * tk + tn * tk + tn)   # double-buffered inputs
                  + 2 * 4 * (tm * tn)                # double-buffered output
                  + 4 * (tm * tn)                    # f32 accumulator
                  + (4 << 20))                       # headroom
    vmem_limit = int(min(max(vmem_bytes, 8 << 20), 48 << 20))

    if grid_k == 1:
        # Fast path: whole reduction dim in one tile -> no scratch, 2-D grid.
        out_p = pl.pallas_call(
            _linear_kernel_single,
            out_shape=jax.ShapeDtypeStruct((Bp, Op), jnp.float32),
            grid_spec=pltpu.PrefetchScalarGridSpec(
                num_scalar_prefetch=0,
                grid=(grid_m, grid_n),
                in_specs=[
                    pl.BlockSpec((tm, tk), lambda i, j: (i, 0)),   # x   (B, F)
                    pl.BlockSpec((tn, tk), lambda i, j: (j, 0)),   # W   (O, F)
                    pl.BlockSpec((1, tn), lambda i, j: (0, j)),    # bias
                ],
                out_specs=pl.BlockSpec((tm, tn), lambda i, j: (i, j)),
            ),
            compiler_params=pltpu.CompilerParams(
                dimension_semantics=("parallel", "parallel"),
                vmem_limit_bytes=vmem_limit,
            ),
        )(x_p, w_p, b_p)
    else:
        out_p = pl.pallas_call(
            _linear_kernel_acc,
            out_shape=jax.ShapeDtypeStruct((Bp, Op), jnp.float32),
            grid_spec=pltpu.PrefetchScalarGridSpec(
                num_scalar_prefetch=0,
                grid=(grid_m, grid_n, grid_k),
                in_specs=[
                    pl.BlockSpec((tm, tk), lambda i, j, k: (i, k)),   # x   (B, F)
                    pl.BlockSpec((tn, tk), lambda i, j, k: (j, k)),   # W   (O, F)
                    pl.BlockSpec((1, tn), lambda i, j, k: (0, j)),    # bias
                ],
                out_specs=pl.BlockSpec((tm, tn), lambda i, j, k: (i, j)),
                scratch_shapes=[pltpu.VMEM((tm, tn), jnp.float32)],
            ),
            compiler_params=pltpu.CompilerParams(
                # M/N shard across TensorCores; K (reduction) is last and
                # 'arbitrary' so the accumulator stays resident.
                dimension_semantics=("parallel", "parallel", "arbitrary"),
                vmem_limit_bytes=vmem_limit,
            ),
        )(x_p, w_p, b_p)

    return out_p[:B, :O]


if __name__ == "__main__":
    key = jax.random.PRNGKey(0)
    k_x, k_w, k_b = jax.random.split(key, 3)

    # Small shapes consistent with the module: B=2, C=4, H=W=16 -> F=1024, O=10
    B, C, H, W = 2, 4, 16, 16
    F = C * H * W
    O = 10

    x = jax.random.normal(k_x, (B, C, H, W), dtype=jnp.float32)
    # Deterministic parameter init (LazyLinear would infer in_features=F)
    bound = 1.0 / jnp.sqrt(F)
    weight = jax.random.uniform(k_w, (O, F), minval=-bound, maxval=bound,
                                dtype=jnp.float32)
    bias = jax.random.uniform(k_b, (O,), minval=-bound, maxval=bound,
                              dtype=jnp.float32)

    out = my_neural_net_forward(x, weight, bias)
    jax.block_until_ready(out)

    # Reference check in plain JAX
    ref = x.reshape(B, F) @ weight.T + bias
    assert out.shape == (B, O)
    assert jnp.allclose(out, ref, atol=1e-5, rtol=1e-5)

    print("KERNEL_OK")
</pallas_src>

<mosaic_0001>
module attributes {stable_mosaic.version = 11 : i64} {
  func.func @_linear_kernel_single(%arg0: i32, %arg1: i32, %arg2: memref<8x1024xf32, #tpu.memory_space<vmem>>, %arg3: memref<128x1024xf32, #tpu.memory_space<vmem>>, %arg4: memref<1x128xf32, #tpu.memory_space<vmem>>, %arg5: memref<8x128xf32, #tpu.memory_space<vmem>>) attributes {dimension_semantics = [#tpu.dimension_semantics<parallel>, #tpu.dimension_semantics<parallel>], iteration_bounds = array<i64: 1, 1>, scalar_prefetch = 0 : i64, scratch_operands = 0 : i64, tpu.core_type = #tpu.core_type<tc>, window_params = [{transform_indices = @transform_0, window_bounds = array<i64: 8, 1024>}, {transform_indices = @transform_1, window_bounds = array<i64: 128, 1024>}, {transform_indices = @transform_2, window_bounds = array<i64: 1, 128>}, {transform_indices = @transform_3, window_bounds = array<i64: 8, 128>}]} {
    %c0 = arith.constant 0 : index
    %c0_0 = arith.constant 0 : index
    %0 = vector.load %arg2[%c0, %c0_0] : memref<8x1024xf32, #tpu.memory_space<vmem>>, vector<8x1024xf32>
    %c0_1 = arith.constant 0 : index
    %c0_2 = arith.constant 0 : index
    %1 = vector.load %arg3[%c0_1, %c0_2] : memref<128x1024xf32, #tpu.memory_space<vmem>>, vector<128x1024xf32>
    %cst = arith.constant dense<0.000000e+00> : vector<8x128xf32>
    %2 = tpu.matmul %0, %1, %cst {dimension_numbers = #tpu.dot_dimension_numbers<[1], [1], [0], [0], [0, 0, 1, 0], [], []>} : vector<8x1024xf32>, vector<128x1024xf32>, vector<8x128xf32> -> vector<8x128xf32>
    %c0_3 = arith.constant 0 : index
    %c0_4 = arith.constant 0 : index
    %3 = vector.load %arg4[%c0_3, %c0_4] : memref<1x128xf32, #tpu.memory_space<vmem>>, vector<1x128xf32>
    %4 = vector.broadcast %3 : vector<1x128xf32> to vector<8x128xf32>
    %5 = arith.addf %2, %4 : vector<8x128xf32>
    %c0_5 = arith.constant 0 : index
    %c0_6 = arith.constant 0 : index
    %6 = vector.load %arg5[%c0_5, %c0_6] : memref<8x128xf32, #tpu.memory_space<vmem>>, vector<8x128xf32>
    tpu.vector_store %arg5[%c0_5, %c0_6], %5 {strides = array<i32>} : memref<8x128xf32, #tpu.memory_space<vmem>>, vector<8x128xf32>,
    return
  }
  func.func @transform_0(%arg0: i32, %arg1: i32) -> (i32, i32) {
    %c0_i32 = arith.constant 0 : i32
    %c0_i32_0 = arith.constant 0 : i32
    return %arg0, %c0_i32 : i32, i32
  }
  func.func @transform_1(%arg0: i32, %arg1: i32) -> (i32, i32) {
    %c0_i32 = arith.constant 0 : i32
    %c0_i32_0 = arith.constant 0 : i32
    return %arg1, %c0_i32 : i32, i32
  }
  func.func @transform_2(%arg0: i32, %arg1: i32) -> (i32, i32) {
    %c0_i32 = arith.constant 0 : i32
    %c0_i32_0 = arith.constant 0 : i32
    return %c0_i32, %arg1 : i32, i32
  }
  func.func @transform_3(%arg0: i32, %arg1: i32) -> (i32, i32) {
    %c0_i32 = arith.constant 0 : i32
    return %arg0, %arg1 : i32, i32
  }
}

</mosaic_0001>

<bundles_post_ra>
// kernel: my_neural_net_forward.1
= control target key start
LH: loop header
LB: loop body
LE: loop exit
PB: predicated region body
PF: predicated region fallthrough
CT: control target
= control target key end

     0   :  { %s1011_s1 = inlined_call_operand.vmem [shape: f32[128,1024], index: 1, kind: input, shape index: {}]   ;;  %s1012_s0 = inlined_call_operand.vmem [shape: f32[8,1024], index: 0, kind: input, shape index: {}]   ;;  %s1013_s2 = inlined_call_operand.vmem [shape: f32[1,128], index: 2, kind: input, shape index: {}]   ;;  %s1014_s3 = inlined_call_operand.vmem [shape: f32[8,128], index: 3, kind: output, shape index: {}]  }
   0x1   :  { %v23_v0 = vld [vmem:[%s1011_s1 + $0x8] sm:$0xff]  ;;  %v22_v5 = vld [vmem:[%s1011_s1] sm:$0xff] }
   0x2   :  { %v31_v1 = vld [vmem:[%s1011_s1 + $0x48] sm:$0xff]  ;;  %v30_v6 = vld [vmem:[%s1011_s1 + $0x40] sm:$0xff] }
   0x3   :  { %v27_v2 = vld [vmem:[%s1011_s1 + $0x28] sm:$0xff]  ;;  %v443_v3 = vpack.c.bf16 %v31_v1, %v23_v0  ;;  %v445_v8 = vpack.c.bf16 %v30_v6, %v22_v5  ;;  %v26_v9 = vld [vmem:[%s1011_s1 + $0x20] sm:$0xff] }
   0x4   :  { %v35_v4 = vld [vmem:[%s1011_s1 + $0x68] sm:$0xff]  ;;  %v34_v10 = vld [vmem:[%s1011_s1 + $0x60] sm:$0xff] }
   0x5   :  { %v507_v7 = vpack.c.bf16 %v35_v4, %v27_v2  ;;  %v39_v11 = vld [vmem:[%s1011_s1 + $0x88] sm:$0xff]  ;;  %444 = vmatprep.subr.bf16.mxu1 %v443_v3  ;;  %v509_v12 = vpack.c.bf16 %v34_v10, %v26_v9  ;;  %v38_v18 = vld [vmem:[%s1011_s1 + $0x80] sm:$0xff] }
   0x6   :  { %v47_v13 = vld [vmem:[%s1011_s1 + $0xc8] sm:$0xff]  ;;  %446 = vmatpush1.bf16.xpose.msra.mxu1 %v445_v8  ;;  %v46_v19 = vld [vmem:[%s1011_s1 + $0xc0] sm:$0xff] }
   0x7   :  { %v43_v14 = vld [vmem:[%s1011_s1 + $0xa8] sm:$0xff]  ;;  %508 = vmatprep.subr.bf16.mxu0 %v507_v7  ;;  %v447_v16 = vpack.c.bf16 %v47_v13, %v39_v11  ;;  %v42_v20 = vld [vmem:[%s1011_s1 + $0xa0] sm:$0xff]  ;;  %v449_v26 = vpack.c.bf16 %v46_v19, %v38_v18 }
   0x8   :  { %v51_v15 = vld [vmem:[%s1011_s1 + $0xe8] sm:$0xff]  ;;  %510 = vmatpush1.bf16.xpose.msra.mxu0 %v509_v12  ;;  %v50_v21 = vld [vmem:[%s1011_s1 + $0xe0] sm:$0xff] }
   0x9   :  { %v511_v17 = vpack.c.bf16 %v51_v15, %v43_v14  ;;  %448 = vmatprep.subr.bf16.mxu1 %v447_v16  ;;  %v55_v22 = vld [vmem:[%s1011_s1 + $0x108] sm:$0xff]  ;;  %v513_v27 = vpack.c.bf16 %v50_v21, %v42_v20  ;;  %v54_v30 = vld [vmem:[%s1011_s1 + $0x100] sm:$0xff] }
   0xa   :  { %v63_v23 = vld [vmem:[%s1011_s1 + $0x148] sm:$0xff]  ;;  %v62_v31 = vld [vmem:[%s1011_s1 + $0x140] sm:$0xff] }
   0xb   :  { %512 = vmatprep.subr.bf16.mxu0 %v511_v17  ;;  %v59_v24 = vld [vmem:[%s1011_s1 + $0x128] sm:$0xff]  ;;  %v451_v28 = vpack.c.bf16 %v63_v23, %v55_v22  ;;  %v58_v32 = vld [vmem:[%s1011_s1 + $0x120] sm:$0xff]  ;;  %v453_v38 = vpack.c.bf16 %v62_v31, %v54_v30 }
   0xc   :  { %v67_v25 = vld [vmem:[%s1011_s1 + $0x168] sm:$0xff]  ;;  %v66_v33 = vld [vmem:[%s1011_s1 + $0x160] sm:$0xff] }
   0xd   :  { %v515_v29 = vpack.c.bf16 %v67_v25, %v59_v24  ;;  %v71_v34 = vld [vmem:[%s1011_s1 + $0x188] sm:$0xff]  ;;  %v517_v39 = vpack.c.bf16 %v66_v33, %v58_v32  ;;  %v70_v42 = vld [vmem:[%s1011_s1 + $0x180] sm:$0xff]  ;;  %v25_v32 = vld [vmem:[%s1011_s1 + $0x18] sm:$0xff] }
   0xe   :  { %450 = vmatpush1.bf16.xpose.msra.mxu1 %v449_v26  ;;  %v79_v35 = vld [vmem:[%s1011_s1 + $0x1c8] sm:$0xff]  ;;  %v78_v43 = vld [vmem:[%s1011_s1 + $0x1c0] sm:$0xff]  ;;  %v33_v33 = vld [vmem:[%s1011_s1 + $0x58] sm:$0xff] }
   0xf   :  { %452 = vmatprep.subr.bf16.mxu1 %v451_v28  ;;  %v75_v36 = vld [vmem:[%s1011_s1 + $0x1a8] sm:$0xff]  ;;  %v455_v40 = vpack.c.bf16 %v79_v35, %v71_v34  ;;  %v74_v44 = vld [vmem:[%s1011_s1 + $0x1a0] sm:$0xff]  ;;  %v457_v52 = vpack.c.bf16 %v78_v43, %v70_v42  ;;  %v29_v34 = vld [vmem:[%s1011_s1 + $0x38] sm:$0xff] }
  0x10   :  { %514 = vmatpush1.bf16.xpose.msra.mxu0 %v513_v27  ;;  %v83_v37 = vld [vmem:[%s1011_s1 + $0x1e8] sm:$0xff]  ;;  %v82_v45 = vld [vmem:[%s1011_s1 + $0x1e0] sm:$0xff]  ;;  %v37_v35 = vld [vmem:[%s1011_s1 + $0x78] sm:$0xff] }
  0x11   :  { %516 = vmatprep.subr.bf16.mxu0 %v515_v29  ;;  %v519_v41 = vpack.c.bf16 %v83_v37, %v75_v36  ;;  %v15_v46 = vld [vmem:[%s1012_s0 + $0x8] sm:$0xff]  ;;  %v521_v53 = vpack.c.bf16 %v82_v45, %v74_v44  ;;  %v86_v56 = vld [vmem:[%s1011_s1 + $0x200] sm:$0xff]  ;;  %v28_v42 = vld [vmem:[%s1011_s1 + $0x30] sm:$0xff] }
  0x12   :  { %v87_v47 = vld [vmem:[%s1011_s1 + $0x208] sm:$0xff]  ;;  %221 = vmatprep.mubr.f32.mxu1 %v15_v46  ;;  %v94_v57 = vld [vmem:[%s1011_s1 + $0x240] sm:$0xff]  ;;  %v36_v43 = vld [vmem:[%s1011_s1 + $0x70] sm:$0xff] }
  0x13   :  { %v95_v48 = vld [vmem:[%s1011_s1 + $0x248] sm:$0xff]  ;;  %v90_v58 = vld [vmem:[%s1011_s1 + $0x220] sm:$0xff]  ;;  %v461_v0 = vpack.c.bf16 %v94_v57, %v86_v56  ;;  %v41_v44 = vld [vmem:[%s1011_s1 + $0x98] sm:$0xff] }
  0x14   :  { %v19_v49 = vld [vmem:[%s1012_s0 + $0x28] sm:$0xff]  ;;  %v459_v54 = vpack.c.bf16 %v95_v48, %v87_v47  ;;  %v98_v59 = vld [vmem:[%s1011_s1 + $0x260] sm:$0xff]  ;;  %v49_v45 = vld [vmem:[%s1011_s1 + $0xd8] sm:$0xff] }
  0x15   :  { %v91_v50 = vld [vmem:[%s1011_s1 + $0x228] sm:$0xff]  ;;  %361 = vmatprep.mubr.f32.mxu0 %v19_v49  ;;  %v525_v1 = vpack.c.bf16 %v98_v59, %v90_v58  ;;  %v102_v4 = vld [vmem:[%s1011_s1 + $0x280] sm:$0xff]  ;;  %v45_v46 = vld [vmem:[%s1011_s1 + $0xb8] sm:$0xff] }
  0x16   :  { %454 = vmatpush1.bf16.xpose.msra.mxu1 %v453_v38  ;;  %v99_v51 = vld [vmem:[%s1011_s1 + $0x268] sm:$0xff]  ;;  %v110_v5 = vld [vmem:[%s1011_s1 + $0x2c0] sm:$0xff]  ;;  %v475_v38 = vpack.c.bf16 %v33_v33, %v25_v32  ;;  %v53_v47 = vld [vmem:[%s1011_s1 + $0xf8] sm:$0xff] }
  0x17   :  { %456 = vmatprep.subr.bf16.mxu1 %v455_v40  ;;  %v523_v55 = vpack.c.bf16 %v99_v51, %v91_v50  ;;  %v103_v60 = vld [vmem:[%s1011_s1 + $0x288] sm:$0xff]  ;;  %v106_v6 = vld [vmem:[%s1011_s1 + $0x2a0] sm:$0xff]  ;;  %v465_v12 = vpack.c.bf16 %v110_v5, %v102_v4  ;;  %v24_v40 = vld [vmem:[%s1011_s1 + $0x10] sm:$0xff]  ;;  %v541_v51 = vpack.c.bf16 %v36_v43, %v28_v42 }
  0x18   :  { %518 = vmatpush1.bf16.xpose.msra.mxu0 %v517_v39  ;;  %v111_v61 = vld [vmem:[%s1011_s1 + $0x2c8] sm:$0xff]  ;;  %v114_v7 = vld [vmem:[%s1011_s1 + $0x2e0] sm:$0xff]  ;;  %v539_v39 = vpack.c.bf16 %v37_v35, %v29_v34  ;;  %v40_v56 = vld [vmem:[%s1011_s1 + $0x90] sm:$0xff] }
  0x19   :  { %520 = vmatprep.subr.bf16.mxu0 %v519_v41  ;;  %v107_v62 = vld [vmem:[%s1011_s1 + $0x2a8] sm:$0xff]  ;;  %v463_v2 = vpack.c.bf16 %v111_v61, %v103_v60  ;;  %v529_v13 = vpack.c.bf16 %v114_v7, %v106_v6  ;;  %v118_v16 = vld [vmem:[%s1011_s1 + $0x300] sm:$0xff]  ;;  %v32_v41 = vld [vmem:[%s1011_s1 + $0x50] sm:$0xff] }
  0x1a   :  { %v115_v63 = vld [vmem:[%s1011_s1 + $0x2e8] sm:$0xff]  ;;  %v126_v17 = vld [vmem:[%s1011_s1 + $0x340] sm:$0xff]  ;;  %v477_v49 = vpack.c.bf16 %v32_v41, %v24_v40  ;;  %v48_v57 = vld [vmem:[%s1011_s1 + $0xd0] sm:$0xff] }
  0x1b   :  { %v527_v3 = vpack.c.bf16 %v115_v63, %v107_v62  ;;  %v119_v8 = vld [vmem:[%s1011_s1 + $0x308] sm:$0xff]  ;;  %v122_v18 = vld [vmem:[%s1011_s1 + $0x320] sm:$0xff]  ;;  %v469_v24 = vpack.c.bf16 %v126_v17, %v118_v16  ;;  %v44_v58 = vld [vmem:[%s1011_s1 + $0xb0] sm:$0xff] }
  0x1c   :  { %v127_v9 = vld [vmem:[%s1011_s1 + $0x348] sm:$0xff]  ;;  %v130_v19 = vld [vmem:[%s1011_s1 + $0x360] sm:$0xff]  ;;  %v52_v59 = vld [vmem:[%s1011_s1 + $0xf0] sm:$0xff] }
  0x1d   :  { %v123_v10 = vld [vmem:[%s1011_s1 + $0x328] sm:$0xff]  ;;  %v467_v14 = vpack.c.bf16 %v127_v9, %v119_v8  ;;  %v533_v25 = vpack.c.bf16 %v130_v19, %v122_v18  ;;  %v134_v28 = vld [vmem:[%s1011_s1 + $0x380] sm:$0xff]  ;;  %v57_v60 = vld [vmem:[%s1011_s1 + $0x118] sm:$0xff] }
  0x1e   :  { %458 = vmatpush1.bf16.xpose.msra.mxu1 %v457_v52  ;;  %v131_v11 = vld [vmem:[%s1011_s1 + $0x368] sm:$0xff]  ;;  %v142_v29 = vld [vmem:[%s1011_s1 + $0x3c0] sm:$0xff]  ;;  %v479_v52 = vpack.c.bf16 %v49_v45, %v41_v44  ;;  %v65_v61 = vld [vmem:[%s1011_s1 + $0x158] sm:$0xff] }
  0x1f   :  { %460 = vmatprep.subr.bf16.mxu1 %v459_v54  ;;  %v531_v15 = vpack.c.bf16 %v131_v11, %v123_v10  ;;  %v135_v20 = vld [vmem:[%s1011_s1 + $0x388] sm:$0xff]  ;;  %v138_v30 = vld [vmem:[%s1011_s1 + $0x3a0] sm:$0xff]  ;;  %v473_v36 = vpack.c.bf16 %v142_v29, %v134_v28  ;;  %v17_v54 = vld [vmem:[%s1012_s0 + $0x18] sm:$0xff] }
  0x20   :  { %522 = vmatpush1.bf16.xpose.msra.mxu0 %v521_v53  ;;  %v143_v21 = vld [vmem:[%s1011_s1 + $0x3c8] sm:$0xff]  ;;  %v146_v31 = vld [vmem:[%s1011_s1 + $0x3e0] sm:$0xff]  ;;  %v543_v53 = vpack.c.bf16 %v53_v47, %v45_v46  ;;  %v61_v62 = vld [vmem:[%s1011_s1 + $0x138] sm:$0xff] }
  0x21   :  { %524 = vmatprep.subr.bf16.mxu0 %v523_v55  ;;  %v139_v22 = vld [vmem:[%s1011_s1 + $0x3a8] sm:$0xff]  ;;  %v471_v26 = vpack.c.bf16 %v143_v21, %v135_v20  ;;  %v537_v37 = vpack.c.bf16 %v146_v31, %v138_v30  ;;  %v14_v48 = vld [vmem:[%s1012_s0] sm:$0xff]  ;;  %v21_v55 = vld [vmem:[%s1012_s0 + $0x38] sm:$0xff] }
  0x22   :  { %v147_v23 = vld [vmem:[%s1011_s1 + $0x3e8] sm:$0xff]  ;;  %v18_v50 = vld [vmem:[%s1012_s0 + $0x20] sm:$0xff]  ;;  %v69_v63 = vld [vmem:[%s1011_s1 + $0x178] sm:$0xff] }
  0x23   :  { %v535_v27 = vpack.c.bf16 %v147_v23, %v139_v22  ;;  %v56_v4 = vld [vmem:[%s1011_s1 + $0x110] sm:$0xff]  ;;  %v73_v8 = vld [vmem:[%s1011_s1 + $0x198] sm:$0xff] }
  0x24   :  { %v64_v5 = vld [vmem:[%s1011_s1 + $0x150] sm:$0xff]  ;;  %v81_v9 = vld [vmem:[%s1011_s1 + $0x1d8] sm:$0xff] }
  0x25   :  { %v60_v6 = vld [vmem:[%s1011_s1 + $0x130] sm:$0xff]  ;;  %v77_v10 = vld [vmem:[%s1011_s1 + $0x1b8] sm:$0xff] }
  0x26   :  { %462 = vmatpush1.bf16.xpose.msra.mxu1 %v461_v0  ;;  %v481_v0 = vpack.c.bf16 %v48_v57, %v40_v56  ;;  %v68_v7 = vld [vmem:[%s1011_s1 + $0x170] sm:$0xff]  ;;  %v85_v11 = vld [vmem:[%s1011_s1 + $0x1f8] sm:$0xff] }
  0x27   :  { %464 = vmatprep.subr.bf16.mxu1 %v463_v2  ;;  %v483_v2 = vpack.c.bf16 %v65_v61, %v57_v60  ;;  %v72_v16 = vld [vmem:[%s1011_s1 + $0x190] sm:$0xff]  ;;  %v89_v20 = vld [vmem:[%s1011_s1 + $0x218] sm:$0xff] }
  0x28   :  { %526 = vmatpush1.bf16.xpose.msra.mxu0 %v525_v1  ;;  %v545_v1 = vpack.c.bf16 %v52_v59, %v44_v58  ;;  %v80_v17 = vld [vmem:[%s1011_s1 + $0x1d0] sm:$0xff]  ;;  %v97_v21 = vld [vmem:[%s1011_s1 + $0x258] sm:$0xff] }
  0x29   :  { %528 = vmatprep.subr.bf16.mxu0 %v527_v3  ;;  %v547_v3 = vpack.c.bf16 %v69_v63, %v61_v62  ;;  %v76_v18 = vld [vmem:[%s1011_s1 + $0x1b0] sm:$0xff]  ;;  %v93_v22 = vld [vmem:[%s1011_s1 + $0x238] sm:$0xff] }
  0x2a   :  { %v84_v19 = vld [vmem:[%s1011_s1 + $0x1f0] sm:$0xff]  ;;  %v101_v23 = vld [vmem:[%s1011_s1 + $0x278] sm:$0xff] }
  0x2b   :  { %v88_v28 = vld [vmem:[%s1011_s1 + $0x210] sm:$0xff]  ;;  %v105_v32 = vld [vmem:[%s1011_s1 + $0x298] sm:$0xff] }
  0x2c   :  { %v96_v29 = vld [vmem:[%s1011_s1 + $0x250] sm:$0xff]  ;;  %v113_v33 = vld [vmem:[%s1011_s1 + $0x2d8] sm:$0xff] }
  0x2d   :  { %v92_v30 = vld [vmem:[%s1011_s1 + $0x230] sm:$0xff]  ;;  %v109_v34 = vld [vmem:[%s1011_s1 + $0x2b8] sm:$0xff] }
  0x2e   :  { %466 = vmatpush1.bf16.xpose.msra.mxu1 %v465_v12  ;;  %v485_v12 = vpack.c.bf16 %v64_v5, %v56_v4  ;;  %v100_v31 = vld [vmem:[%s1011_s1 + $0x270] sm:$0xff]  ;;  %v117_v35 = vld [vmem:[%s1011_s1 + $0x2f8] sm:$0xff] }
  0x2f   :  { %468 = vmatprep.subr.bf16.mxu1 %v467_v14  ;;  %v487_v14 = vpack.c.bf16 %v81_v9, %v73_v8  ;;  %v104_v40 = vld [vmem:[%s1011_s1 + $0x290] sm:$0xff]  ;;  %v121_v44 = vld [vmem:[%s1011_s1 + $0x318] sm:$0xff]  ;;  %v442_v8 = vld [vmem:[%s1013_s2] ss:$0 sm:$0xff] }
  0x30   :  { %530 = vmatpush1.bf16.xpose.msra.mxu0 %v529_v13  ;;  %v549_v13 = vpack.c.bf16 %v68_v7, %v60_v6  ;;  %v112_v41 = vld [vmem:[%s1011_s1 + $0x2d0] sm:$0xff]  ;;  %v129_v45 = vld [vmem:[%s1011_s1 + $0x358] sm:$0xff] }
  0x31   :  { %532 = vmatprep.subr.bf16.mxu0 %v531_v15  ;;  %v551_v15 = vpack.c.bf16 %v85_v11, %v77_v10  ;;  %v108_v42 = vld [vmem:[%s1011_s1 + $0x2b0] sm:$0xff]  ;;  %v125_v46 = vld [vmem:[%s1011_s1 + $0x338] sm:$0xff] }
  0x32   :  { %v116_v43 = vld [vmem:[%s1011_s1 + $0x2f0] sm:$0xff]  ;;  %v133_v47 = vld [vmem:[%s1011_s1 + $0x378] sm:$0xff] }
  0x33   :  { %v137_v56 = vld [vmem:[%s1011_s1 + $0x398] sm:$0xff]  ;;  %v16_v6 = vld [vmem:[%s1012_s0 + $0x10] sm:$0xff] }
  0x34   :  { %v145_v57 = vld [vmem:[%s1011_s1 + $0x3d8] sm:$0xff]  ;;  %v20_v7 = vld [vmem:[%s1012_s0 + $0x30] sm:$0xff] }
  0x35   :  { %v141_v58 = vld [vmem:[%s1011_s1 + $0x3b8] sm:$0xff]  ;;  %v503_v62 = vpack.c.bf16 %v145_v57, %v137_v56 }
  0x36   :  { %470 = vmatpush1.bf16.xpose.msra.mxu1 %v469_v24  ;;  %v489_v24 = vpack.c.bf16 %v80_v17, %v72_v16  ;;  %v149_v59 = vld [vmem:[%s1011_s1 + $0x3f8] sm:$0xff] }
  0x37   :  { %472 = vmatprep.subr.bf16.mxu1 %v471_v26  ;;  %v491_v26 = vpack.c.bf16 %v97_v21, %v89_v20  ;;  %v567_v63 = vpack.c.bf16 %v149_v59, %v141_v58 }
  0x38   :  { %534 = vmatpush1.bf16.xpose.msra.mxu0 %v533_v25  ;;  %v553_v25 = vpack.c.bf16 %v84_v19, %v76_v18 }
  0x39   :  { %536 = vmatprep.subr.bf16.mxu0 %v535_v27  ;;  %v555_v27 = vpack.c.bf16 %v101_v23, %v93_v22 }
  0x3e   :  { %474 = vmatpush1.bf16.xpose.msra.mxu1 %v473_v36  ;;  %v493_v36 = vpack.c.bf16 %v96_v29, %v88_v28 }
  0x3f   :  { %476 = vmatprep.subr.bf16.mxu1 %v475_v38  ;;  %v495_v38 = vpack.c.bf16 %v113_v33, %v105_v32 }
  0x40   :  { %538 = vmatpush1.bf16.xpose.msra.mxu0 %v537_v37  ;;  %v557_v37 = vpack.c.bf16 %v100_v31, %v92_v30 }
  0x41   :  { %540 = vmatprep.subr.bf16.mxu0 %v539_v39  ;;  %v559_v39 = vpack.c.bf16 %v117_v35, %v109_v34 }
  0x45   :  { %222 = vmatmul.mubr.f32.vlgmr.msra.gmra.mrb[0].mxu1 %v14_v48  ;;  %v497_v48 = vpack.c.bf16 %v112_v41, %v104_v40 }
  0x46   :  { %478 = vmatpush1.bf16.xpose.msra.mxu1 %v477_v49  ;;  %291 = vmatprep.mubr.f32.mxu1 %v17_v54  ;;  %v561_v49 = vpack.c.bf16 %v116_v43, %v108_v42  ;;  %v124_v54 = vld [vmem:[%s1011_s1 + $0x330] sm:$0xff] }
  0x47   :  { %362 = vmatmul.mubr.f32.vlgmr.msra.gmra.mrb[0].mxu0 %v18_v50  ;;  %480 = vmatprep.subr.bf16.mxu1 %v479_v52  ;;  %v499_v50 = vpack.c.bf16 %v129_v45, %v121_v44  ;;  %v120_v52 = vld [vmem:[%s1011_s1 + $0x310] sm:$0xff] }
  0x48   :  { %542 = vmatpush1.bf16.xpose.msra.mxu0 %v541_v51  ;;  %431 = vmatprep.mubr.f32.mxu0 %v21_v55  ;;  %v563_v51 = vpack.c.bf16 %v133_v47, %v125_v46  ;;  %v132_v55 = vld [vmem:[%s1011_s1 + $0x370] sm:$0xff] }
  0x49   :  { %544 = vmatprep.subr.bf16.mxu0 %v543_v53  ;;  %v128_v53 = vld [vmem:[%s1011_s1 + $0x350] sm:$0xff]  ;;  %v565_v61 = vpack.c.bf16 %v132_v55, %v124_v54 }
  0x4a   :  { %v501_v60 = vpack.c.bf16 %v128_v53, %v120_v52 }
  0x4e   :  { %482 = vmatpush1.bf16.xpose.msra.mxu1 %v481_v0  ;;  %v136_v0 = vld [vmem:[%s1011_s1 + $0x390] sm:$0xff] }
  0x4f   :  { %484 = vmatprep.subr.bf16.mxu1 %v483_v2  ;;  %v140_v2 = vld [vmem:[%s1011_s1 + $0x3b0] sm:$0xff] }
  0x50   :  { %546 = vmatpush1.bf16.xpose.msra.mxu0 %v545_v1  ;;  %v144_v1 = vld [vmem:[%s1011_s1 + $0x3d0] sm:$0xff] }
  0x51   :  { %548 = vmatprep.subr.bf16.mxu0 %v547_v3  ;;  %v148_v3 = vld [vmem:[%s1011_s1 + $0x3f0] sm:$0xff]  ;;  %v505_v4 = vpack.c.bf16 %v144_v1, %v136_v0 }
  0x52   :  { %v569_v5 = vpack.c.bf16 %v148_v3, %v140_v2 }
  0x56   :  { %486 = vmatpush1.bf16.xpose.msra.mxu1 %v485_v12 }
  0x57   :  { %488 = vmatprep.subr.bf16.mxu1 %v487_v14 }
  0x58   :  { %550 = vmatpush1.bf16.xpose.msra.mxu0 %v549_v13 }
  0x59   :  { %552 = vmatprep.subr.bf16.mxu0 %v551_v15 }
  0x5e   :  { %490 = vmatpush1.bf16.xpose.msra.mxu1 %v489_v24 }
  0x5f   :  { %492 = vmatprep.subr.bf16.mxu1 %v491_v26 }
  0x60   :  { %554 = vmatpush1.bf16.xpose.msra.mxu0 %v553_v25 }
  0x61   :  { %556 = vmatprep.subr.bf16.mxu0 %v555_v27 }
  0x66   :  { %494 = vmatpush1.bf16.xpose.msra.mxu1 %v493_v36 }
  0x67   :  { %496 = vmatprep.subr.bf16.mxu1 %v495_v38 }
  0x68   :  { %558 = vmatpush1.bf16.xpose.msra.mxu0 %v557_v37 }
  0x69   :  { %560 = vmatprep.subr.bf16.mxu0 %v559_v39 }
  0x6e   :  { %498 = vmatpush1.bf16.xpose.msra.mxu1 %v497_v48 }
  0x6f   :  { %500 = vmatprep.subr.bf16.mxu1 %v499_v50 }
  0x70   :  { %562 = vmatpush1.bf16.xpose.msra.mxu0 %v561_v49 }
  0x71   :  { %564 = vmatprep.subr.bf16.mxu0 %v563_v51 }
  0x76   :  { %502 = vmatpush1.bf16.xpose.msra.mxu1 %v501_v60 }
  0x77   :  { %504 = vmatprep.subr.bf16.mxu1 %v503_v62 }
  0x78   :  { %566 = vmatpush1.bf16.xpose.msra.mxu0 %v565_v61 }
  0x79   :  { %568 = vmatprep.subr.bf16.mxu0 %v567_v63 }
  0x7e   :  { %506 = vmatpush1.bf16.xpose.msra.mxu1 %v505_v4 }
  0x80   :  { %570 = vmatpush1.bf16.xpose.msra.mxu0 %v569_v5 }
  0x85   :  { %292 = vmatmul.mubr.f32.vlgmr.msra.gmra.mrb[0].mxu1 %v16_v6 }
  0x87   :  { %432 = vmatmul.mubr.f32.vlgmr.msra.gmra.mrb[0].mxu0 %v20_v7 }
 0x158   :  { %v293_v9 = vpop.f32.mrb[0].mxu1 }
 0x159   :  { %v571_v10 = vadd.f32 %v442_v8, %v293_v9  ;;  %v295_v12 = vpop.f32.mrb[1].mxu1 }
 0x15a   :  { %v433_v11 = vpop.f32.mrb[0].mxu0 }
 0x15b   :  { %v435_v13 = vpop.f32.mrb[1].mxu0  ;;  %v572_v14 = vadd.f32 %v571_v10, %v433_v11 }
 0x15d   :  { %437 = vst [vmem:[%s1014_s3] sm:$0xff] %v572_v14 }

</bundles_post_ra>
